<compile_context>
chip_gen: v5e
topology: v5e:2x2
jax: 0.10.0
libtpu: 0.0.40
codegen_flags: <defaults>
</compile_context>

<pallas_src>
import functools

import jax
import jax.numpy as jnp
from jax.experimental import pallas as pl
from jax.experimental.pallas import tpu as pltpu


LANE = 128          # lane-dense padding target for hidden/output feature dims
TB_MAX = 1024       # max rows per batch tile (multiple of 16)


def _round_up(x, m):
    return (x + m - 1) // m * m


def _pad_to(a, rows, cols):
    """Zero-pad a 2-D array up to (rows, cols)."""
    return jnp.pad(a, ((0, rows - a.shape[0]), (0, cols - a.shape[1])))


def _pick_act_dtype():
    """bf16 activation math on chips with bf16 VPU/EUP (v6e/v7x), f32 otherwise."""
    try:
        kind = jax.devices()[0].device_kind.lower()
    except Exception:
        return jnp.float32
    for old in ("v2", "v3", "v4", "v5"):
        if old in kind:
            return jnp.float32
    return jnp.bfloat16


def _dnn_kernel(x_ref,
                w1_ref, b1_ref,
                w2_ref, b2_ref,
                w3_ref, b3_ref,
                w4_ref, b4_ref,
                o_ref, *, act_dtype):
    # x arrives f32 and lane-unpadded; cast to bf16 only for the MXU push.
    x = x_ref[...].astype(jnp.bfloat16)

    def layer(h_bf16, w_ref, b_ref, activate):
        acc = jnp.dot(h_bf16, w_ref[...], preferred_element_type=jnp.float32)
        h = acc.astype(act_dtype) + b_ref[...]          # bias broadcast on VPU
        if activate:
            # sigmoid(z) == 0.5 * (tanh(z/2) + 1): one EUP op per element.
            h = 0.5 * (jnp.tanh(0.5 * h) + 1.0)
            return h.astype(jnp.bfloat16)               # no-op on the bf16 path
        return h

    h = layer(x, w1_ref, b1_ref, True)
    h = layer(h, w2_ref, b2_ref, True)
    h = layer(h, w3_ref, b3_ref, True)
    out = layer(h, w4_ref, b4_ref, False)
    o_ref[...] = out.astype(o_ref.dtype)


def prepare_params(params, act_dtype):
    """One-time pad + cast of the weights/biases (call once, reuse every forward).

    Weights stored as (in, out).  Hidden/output dims are zero-padded to 128 so
    every MXU push past layer 1 is full-width and every store is lane-dense.
    w1's row dim stays at the real n_input (matches the unpadded x lanes).
    Zero padding is inert: padded W rows are zero, so sigmoid(0)=0.5 values in
    padded hidden lanes never contribute; padded bias lanes are zero.
    """
    w1, b1 = params["w1"], params["b1"]
    w2, b2 = params["w2"], params["b2"]
    w3, b3 = params["w3"], params["b3"]
    w4, b4 = params["w4"], params["b4"]

    n_in = w1.shape[0]
    n_h1_p = _round_up(w1.shape[1], LANE)
    n_h2_p = _round_up(w2.shape[1], LANE)
    n_h3_p = _round_up(w3.shape[1], LANE)
    n_out_p = _round_up(w4.shape[1], LANE)

    prepped = {
        "w1": _pad_to(w1, n_in, n_h1_p).astype(jnp.bfloat16),
        "w2": _pad_to(w2, n_h1_p, n_h2_p).astype(jnp.bfloat16),
        "w3": _pad_to(w3, n_h2_p, n_h3_p).astype(jnp.bfloat16),
        "w4": _pad_to(w4, n_h3_p, n_out_p).astype(jnp.bfloat16),
        "b1": _pad_to(b1, 1, n_h1_p).astype(act_dtype),
        "b2": _pad_to(b2, 1, n_h2_p).astype(act_dtype),
        "b3": _pad_to(b3, 1, n_h3_p).astype(act_dtype),
        "b4": _pad_to(b4, 1, n_out_p).astype(act_dtype),
    }
    return jax.tree_util.tree_map(jnp.asarray, prepped)


def _batch_tiling(B):
    """Pick (TB, Bp, n_steps): TB multiple of 16 (or == B for tiny batches),
    >= 2 grid steps when the batch allows it (v7x 2-TC sharding), and minimal
    batch-pad waste."""
    if B < 32:
        return B, B, 1                      # full-dim block, no batch padding
    n_steps = max(2, pl.cdiv(B, TB_MAX))
    TB = _round_up(pl.cdiv(B, n_steps), 16)
    return TB, TB * n_steps, n_steps


@functools.partial(jax.jit, static_argnames=("n_out", "act_dtype"))
def dnn_forward(x, prepped, *, n_out, act_dtype):
    """x: (B, n_input) f32.  prepped: output of prepare_params.  Returns (B, n_out) f32."""
    B, n_in = x.shape
    n_h1_p = prepped["w1"].shape[1]
    n_h2_p = prepped["w2"].shape[1]
    n_h3_p = prepped["w3"].shape[1]
    n_out_p = prepped["w4"].shape[1]

    TB, Bp, n_steps = _batch_tiling(B)
    xp = x if Bp == B else jnp.pad(x, ((0, Bp - B), (0, 0)))

    # x / out walk the batch grid; weights & biases are VMEM-resident
    # (constant index_map -> fetched once, reused every step).
    x_spec = pl.BlockSpec((TB, n_in), lambda i: (i, 0))
    out_spec = pl.BlockSpec((TB, n_out_p), lambda i: (i, 0))
    resident = lambda a: pl.BlockSpec(a.shape, lambda i: (0, 0))

    flops = 2 * Bp * (n_in * n_h1_p + n_h1_p * n_h2_p
                      + n_h2_p * n_h3_p + n_h3_p * n_out_p)
    transcendentals = Bp * (n_h1_p + n_h2_p + n_h3_p)
    bytes_accessed = (
        Bp * n_in * 4                                              # x (f32 in)
        + sum(prepped[k].size for k in ("w1", "w2", "w3", "w4")) * 2
        + sum(prepped[k].size * prepped[k].dtype.itemsize for k in ("b1", "b2", "b3", "b4"))
        + Bp * n_out_p * 2                                         # out (bf16)
    )

    out_padded = pl.pallas_call(
        functools.partial(_dnn_kernel, act_dtype=act_dtype),
        out_shape=jax.ShapeDtypeStruct((Bp, n_out_p), jnp.bfloat16),
        grid=(n_steps,),
        in_specs=[x_spec,
                  resident(prepped["w1"]), resident(prepped["b1"]),
                  resident(prepped["w2"]), resident(prepped["b2"]),
                  resident(prepped["w3"]), resident(prepped["b3"]),
                  resident(prepped["w4"]), resident(prepped["b4"])],
        out_specs=out_spec,
        compiler_params=pltpu.CompilerParams(
            dimension_semantics=("parallel",)),
        cost_estimate=pl.CostEstimate(
            flops=flops,
            transcendentals=transcendentals,
            bytes_accessed=bytes_accessed),
    )(xp,
      prepped["w1"], prepped["b1"],
      prepped["w2"], prepped["b2"],
      prepped["w3"], prepped["b3"],
      prepped["w4"], prepped["b4"])

    return out_padded[:B, :n_out].astype(jnp.float32)


def init_dnn_params(key, n_input, n_hidden1, n_hidden2, n_hidden3, n_output):
    """Deterministic init mirroring torch.nn.Linear's U(-1/sqrt(fan_in), +...)."""
    dims = [(n_input, n_hidden1), (n_hidden1, n_hidden2),
            (n_hidden2, n_hidden3), (n_hidden3, n_output)]
    params = {}
    for i, (fan_in, fan_out) in enumerate(dims, start=1):
        key, kw, kb = jax.random.split(key, 3)
        bound = 1.0 / jnp.sqrt(jnp.float32(fan_in))
        # Stored as (in, out) = transpose of torch's (out, in) weight layout.
        params[f"w{i}"] = jax.random.uniform(
            kw, (fan_in, fan_out), jnp.float32, minval=-bound, maxval=bound)
        params[f"b{i}"] = jax.random.uniform(
            kb, (1, fan_out), jnp.float32, minval=-bound, maxval=bound)
    return params


def dnn_reference(x, params):
    h = jax.nn.sigmoid(x @ params["w1"] + params["b1"])
    h = jax.nn.sigmoid(h @ params["w2"] + params["b2"])
    h = jax.nn.sigmoid(h @ params["w3"] + params["b3"])
    return h @ params["w4"] + params["b4"]


if __name__ == "__main__":
    key = jax.random.PRNGKey(0)
    k_x, k_p = jax.random.split(key)

    B = 8
    n_input, n_h1, n_h2, n_h3, n_output = 32, 64, 64, 32, 16

    x = jax.random.normal(k_x, (B, n_input), jnp.float32)
    params = init_dnn_params(k_p, n_input, n_h1, n_h2, n_h3, n_output)

    act_dtype = _pick_act_dtype()                 # bf16 on v6e/v7x, f32 on v5e-
    prepped = prepare_params(params, act_dtype)   # one-time pad + cast

    out = dnn_forward(x, prepped, n_out=n_output, act_dtype=act_dtype)
    out = jax.block_until_ready(out)

    ref = dnn_reference(x, params)
    assert out.shape == (B, n_output)
    # bf16 MXU inputs / bf16 activation math / bf16 writeback with f32
    # accumulation: tolerance loosened accordingly.
    assert jnp.allclose(out, ref, atol=3e-2, rtol=3e-2), "mismatch vs reference"

    print("KERNEL_OK")
</pallas_src>

<mosaic_0001>
module attributes {stable_mosaic.version = 11 : i64} {
  func.func @_dnn_kernel(%arg0: i32, %arg1: memref<8x32xf32, #tpu.memory_space<vmem>>, %arg2: memref<32x128xbf16, #tpu.memory_space<vmem>>, %arg3: memref<1x128xbf16, #tpu.memory_space<vmem>>, %arg4: memref<128x128xbf16, #tpu.memory_space<vmem>>, %arg5: memref<1x128xbf16, #tpu.memory_space<vmem>>, %arg6: memref<128x128xbf16, #tpu.memory_space<vmem>>, %arg7: memref<1x128xbf16, #tpu.memory_space<vmem>>, %arg8: memref<128x128xbf16, #tpu.memory_space<vmem>>, %arg9: memref<1x128xbf16, #tpu.memory_space<vmem>>, %arg10: memref<8x128xbf16, #tpu.memory_space<vmem>>) attributes {dimension_semantics = [#tpu.dimension_semantics<parallel>], iteration_bounds = array<i64: 1>, scalar_prefetch = 0 : i64, scratch_operands = 0 : i64, tpu.core_type = #tpu.core_type<tc>, window_params = [{transform_indices = @transform_0, window_bounds = array<i64: 8, 32>}, {pipeline_mode = #tpu.pipeline_mode<synchronous>, transform_indices = @transform_1, window_bounds = array<i64: 32, 128>}, {pipeline_mode = #tpu.pipeline_mode<synchronous>, transform_indices = @transform_2, window_bounds = array<i64: 1, 128>}, {pipeline_mode = #tpu.pipeline_mode<synchronous>, transform_indices = @transform_3, window_bounds = array<i64: 128, 128>}, {pipeline_mode = #tpu.pipeline_mode<synchronous>, transform_indices = @transform_4, window_bounds = array<i64: 1, 128>}, {pipeline_mode = #tpu.pipeline_mode<synchronous>, transform_indices = @transform_5, window_bounds = array<i64: 128, 128>}, {pipeline_mode = #tpu.pipeline_mode<synchronous>, transform_indices = @transform_6, window_bounds = array<i64: 1, 128>}, {pipeline_mode = #tpu.pipeline_mode<synchronous>, transform_indices = @transform_7, window_bounds = array<i64: 128, 128>}, {pipeline_mode = #tpu.pipeline_mode<synchronous>, transform_indices = @transform_8, window_bounds = array<i64: 1, 128>}, {transform_indices = @transform_9, window_bounds = array<i64: 8, 128>}]} {
    %c0 = arith.constant 0 : index
    %c0_0 = arith.constant 0 : index
    %0 = vector.load %arg1[%c0, %c0_0] : memref<8x32xf32, #tpu.memory_space<vmem>>, vector<8x32xf32>
    %1 = arith.truncf %0 : vector<8x32xf32> to vector<8x32xbf16>
    %c0_1 = arith.constant 0 : index
    %c0_2 = arith.constant 0 : index
    %2 = vector.load %arg2[%c0_1, %c0_2] : memref<32x128xbf16, #tpu.memory_space<vmem>>, vector<32x128xbf16>
    %cst = arith.constant dense<0.000000e+00> : vector<8x128xf32>
    %3 = tpu.matmul %1, %2, %cst {dimension_numbers = #tpu.dot_dimension_numbers<[1], [0], [0], [1], [0, 0, 1, 1], [], []>} : vector<8x32xbf16>, vector<32x128xbf16>, vector<8x128xf32> -> vector<8x128xf32>
    %4 = arith.truncf %3 : vector<8x128xf32> to vector<8x128xbf16>
    %c0_3 = arith.constant 0 : index
    %c0_4 = arith.constant 0 : index
    %5 = vector.load %arg3[%c0_3, %c0_4] : memref<1x128xbf16, #tpu.memory_space<vmem>>, vector<1x128xbf16>
    %6 = vector.broadcast %5 : vector<1x128xbf16> to vector<8x128xbf16>
    %7 = arith.addf %4, %6 : vector<8x128xbf16>
    %cst_5 = arith.constant 5.000000e-01 : bf16
    %8 = vector.broadcast %cst_5 : bf16 to vector<8x128xbf16>
    %9 = arith.mulf %8, %7 : vector<8x128xbf16>
    %10 = math.tanh %9 : vector<8x128xbf16>
    %cst_6 = arith.constant 1.000000e+00 : bf16
    %11 = vector.broadcast %cst_6 : bf16 to vector<8x128xbf16>
    %12 = arith.addf %10, %11 : vector<8x128xbf16>
    %cst_7 = arith.constant 5.000000e-01 : bf16
    %13 = vector.broadcast %cst_7 : bf16 to vector<8x128xbf16>
    %14 = arith.mulf %13, %12 : vector<8x128xbf16>
    %c0_8 = arith.constant 0 : index
    %c0_9 = arith.constant 0 : index
    %15 = vector.load %arg4[%c0_8, %c0_9] : memref<128x128xbf16, #tpu.memory_space<vmem>>, vector<128x128xbf16>
    %cst_10 = arith.constant dense<0.000000e+00> : vector<8x128xf32>
    %16 = tpu.matmul %14, %15, %cst_10 {dimension_numbers = #tpu.dot_dimension_numbers<[1], [0], [0], [1], [0, 0, 1, 1], [], []>} : vector<8x128xbf16>, vector<128x128xbf16>, vector<8x128xf32> -> vector<8x128xf32>
    %17 = arith.truncf %16 : vector<8x128xf32> to vector<8x128xbf16>
    %c0_11 = arith.constant 0 : index
    %c0_12 = arith.constant 0 : index
    %18 = vector.load %arg5[%c0_11, %c0_12] : memref<1x128xbf16, #tpu.memory_space<vmem>>, vector<1x128xbf16>
    %19 = vector.broadcast %18 : vector<1x128xbf16> to vector<8x128xbf16>
    %20 = arith.addf %17, %19 : vector<8x128xbf16>
    %cst_13 = arith.constant 5.000000e-01 : bf16
    %21 = vector.broadcast %cst_13 : bf16 to vector<8x128xbf16>
    %22 = arith.mulf %21, %20 : vector<8x128xbf16>
    %23 = math.tanh %22 : vector<8x128xbf16>
    %cst_14 = arith.constant 1.000000e+00 : bf16
    %24 = vector.broadcast %cst_14 : bf16 to vector<8x128xbf16>
    %25 = arith.addf %23, %24 : vector<8x128xbf16>
    %cst_15 = arith.constant 5.000000e-01 : bf16
    %26 = vector.broadcast %cst_15 : bf16 to vector<8x128xbf16>
    %27 = arith.mulf %26, %25 : vector<8x128xbf16>
    %c0_16 = arith.constant 0 : index
    %c0_17 = arith.constant 0 : index
    %28 = vector.load %arg6[%c0_16, %c0_17] : memref<128x128xbf16, #tpu.memory_space<vmem>>, vector<128x128xbf16>
    %cst_18 = arith.constant dense<0.000000e+00> : vector<8x128xf32>
    %29 = tpu.matmul %27, %28, %cst_18 {dimension_numbers = #tpu.dot_dimension_numbers<[1], [0], [0], [1], [0, 0, 1, 1], [], []>} : vector<8x128xbf16>, vector<128x128xbf16>, vector<8x128xf32> -> vector<8x128xf32>
    %30 = arith.truncf %29 : vector<8x128xf32> to vector<8x128xbf16>
    %c0_19 = arith.constant 0 : index
    %c0_20 = arith.constant 0 : index
    %31 = vector.load %arg7[%c0_19, %c0_20] : memref<1x128xbf16, #tpu.memory_space<vmem>>, vector<1x128xbf16>
    %32 = vector.broadcast %31 : vector<1x128xbf16> to vector<8x128xbf16>
    %33 = arith.addf %30, %32 : vector<8x128xbf16>
    %cst_21 = arith.constant 5.000000e-01 : bf16
    %34 = vector.broadcast %cst_21 : bf16 to vector<8x128xbf16>
    %35 = arith.mulf %34, %33 : vector<8x128xbf16>
    %36 = math.tanh %35 : vector<8x128xbf16>
    %cst_22 = arith.constant 1.000000e+00 : bf16
    %37 = vector.broadcast %cst_22 : bf16 to vector<8x128xbf16>
    %38 = arith.addf %36, %37 : vector<8x128xbf16>
    %cst_23 = arith.constant 5.000000e-01 : bf16
    %39 = vector.broadcast %cst_23 : bf16 to vector<8x128xbf16>
    %40 = arith.mulf %39, %38 : vector<8x128xbf16>
    %c0_24 = arith.constant 0 : index
    %c0_25 = arith.constant 0 : index
    %41 = vector.load %arg8[%c0_24, %c0_25] : memref<128x128xbf16, #tpu.memory_space<vmem>>, vector<128x128xbf16>
    %cst_26 = arith.constant dense<0.000000e+00> : vector<8x128xf32>
    %42 = tpu.matmul %40, %41, %cst_26 {dimension_numbers = #tpu.dot_dimension_numbers<[1], [0], [0], [1], [0, 0, 1, 1], [], []>} : vector<8x128xbf16>, vector<128x128xbf16>, vector<8x128xf32> -> vector<8x128xf32>
    %43 = arith.truncf %42 : vector<8x128xf32> to vector<8x128xbf16>
    %c0_27 = arith.constant 0 : index
    %c0_28 = arith.constant 0 : index
    %44 = vector.load %arg9[%c0_27, %c0_28] : memref<1x128xbf16, #tpu.memory_space<vmem>>, vector<1x128xbf16>
    %45 = vector.broadcast %44 : vector<1x128xbf16> to vector<8x128xbf16>
    %46 = arith.addf %43, %45 : vector<8x128xbf16>
    %c0_29 = arith.constant 0 : index
    %c0_30 = arith.constant 0 : index
    %47 = vector.load %arg10[%c0_29, %c0_30] : memref<8x128xbf16, #tpu.memory_space<vmem>>, vector<8x128xbf16>
    tpu.vector_store %arg10[%c0_29, %c0_30], %46 {strides = array<i32>} : memref<8x128xbf16, #tpu.memory_space<vmem>>, vector<8x128xbf16>,
    return
  }
  func.func @transform_0(%arg0: i32) -> (i32, i32) {
    %c0_i32 = arith.constant 0 : i32
    %c0_i32_0 = arith.constant 0 : i32
    return %arg0, %c0_i32 : i32, i32
  }
  func.func @transform_1(%arg0: i32) -> (i32, i32) {
    %c0_i32 = arith.constant 0 : i32
    %c0_i32_0 = arith.constant 0 : i32
    %c0_i32_1 = arith.constant 0 : i32
    return %c0_i32, %c0_i32_0 : i32, i32
  }
  func.func @transform_2(%arg0: i32) -> (i32, i32) {
    %c0_i32 = arith.constant 0 : i32
    %c0_i32_0 = arith.constant 0 : i32
    %c0_i32_1 = arith.constant 0 : i32
    return %c0_i32, %c0_i32_0 : i32, i32
  }
  func.func @transform_3(%arg0: i32) -> (i32, i32) {
    %c0_i32 = arith.constant 0 : i32
    %c0_i32_0 = arith.constant 0 : i32
    %c0_i32_1 = arith.constant 0 : i32
    return %c0_i32, %c0_i32_0 : i32, i32
  }
  func.func @transform_4(%arg0: i32) -> (i32, i32) {
    %c0_i32 = arith.constant 0 : i32
    %c0_i32_0 = arith.constant 0 : i32
    %c0_i32_1 = arith.constant 0 : i32
    return %c0_i32, %c0_i32_0 : i32, i32
  }
  func.func @transform_5(%arg0: i32) -> (i32, i32) {
    %c0_i32 = arith.constant 0 : i32
    %c0_i32_0 = arith.constant 0 : i32
    %c0_i32_1 = arith.constant 0 : i32
    return %c0_i32, %c0_i32_0 : i32, i32
  }
  func.func @transform_6(%arg0: i32) -> (i32, i32) {
    %c0_i32 = arith.constant 0 : i32
    %c0_i32_0 = arith.constant 0 : i32
    %c0_i32_1 = arith.constant 0 : i32
    return %c0_i32, %c0_i32_0 : i32, i32
  }
  func.func @transform_7(%arg0: i32) -> (i32, i32) {
    %c0_i32 = arith.constant 0 : i32
    %c0_i32_0 = arith.constant 0 : i32
    %c0_i32_1 = arith.constant 0 : i32
    return %c0_i32, %c0_i32_0 : i32, i32
  }
  func.func @transform_8(%arg0: i32) -> (i32, i32) {
    %c0_i32 = arith.constant 0 : i32
    %c0_i32_0 = arith.constant 0 : i32
    %c0_i32_1 = arith.constant 0 : i32
    return %c0_i32, %c0_i32_0 : i32, i32
  }
  func.func @transform_9(%arg0: i32) -> (i32, i32) {
    %c0_i32 = arith.constant 0 : i32
    %c0_i32_0 = arith.constant 0 : i32
    return %arg0, %c0_i32 : i32, i32
  }
}

</mosaic_0001>

<bundles_post_ra>
// kernel: dnn_forward.1
= control target key start
LH: loop header
LB: loop body
LE: loop exit
PB: predicated region body
PF: predicated region fallthrough
CT: control target
= control target key end

     0   :  { %14 = vsyncpa [#allocation3], 0  ;;  %s871_s0 = inlined_call_operand.hbm [shape: f32[8,32], index: 0, kind: input, shape index: {}]   ;;  %s872_s1 = inlined_call_operand.hbm [shape: bf16[32,128], index: 1, kind: input, shape index: {}]   ;;  %s873_s2 = inlined_call_operand.hbm [shape: bf16[1,128], index: 2, kind: input, shape index: {}]   ;;  %s874_s3 = inlined_call_operand.hbm [shape: bf16[128,128], index: 3, kind: input, shape index: {}]   ;;  %s875_s4 = inlined_call_operand.vmem [shape: bf16[1,128], index: 4, kind: input, shape index: {}]   ;;  %s876_s5 = inlined_call_operand.hbm [shape: bf16[128,128], index: 5, kind: input, shape index: {}]   ;;  %s877_s6 = inlined_call_operand.vmem [shape: bf16[1,128], index: 6, kind: input, shape index: {}]   ;;  %s878_s7 = inlined_call_operand.hbm [shape: bf16[128,128], index: 7, kind: input, shape index: {}]   ;;  %s879_s8 = inlined_call_operand.vmem [shape: bf16[1,128], index: 8, kind: input, shape index: {}]   ;;  %s880_s9 = inlined_call_operand.vmem [shape: bf16[8,128], index: 9, kind: output, shape index: {}]  }
   0x1   :  { %15 = vsyncpa [#allocation5], 0 }
   0x2   :  { %16 = vsyncpa [#allocation8], 0  ;;  %s33_s11 = sshll.u32 %s872_s1, 4  ;;  %s34_s11 = int_to_ptr.hbm [resolvable:$true] %s33_s11 }
   0x3   :  { %17 = vsyncpa [#allocation11], 0  ;;  %s771_s12 = smov [#allocation4]   ;;  %s57_s16 = sshll.u32 %s874_s3, 4  ;;  %s58_s16 = int_to_ptr.hbm [resolvable:$true] %s57_s16 }
   0x4   :  { %s35_s13 = sshll.u32 %s771_s12, 4  ;;  %s772_s17 = smov 64   ;;  %s36_s13 = int_to_ptr.vmem [resolvable:$true] %s35_s13 }
   0x5   :  { %s773_s18 = smov 4   ;;  %s774_s19 = smov [#allocation7]  }
   0x6   :  { %41 = dma.hbm_to_vmem [thread:$0]  %s34_s11, 256, %s36_s13, [#allocation5], %s772_s17, %s772_s17, %s773_s18  }
   0x7   :  { %s59_s20 = sshll.u32 %s774_s19, 4  ;;  %s23_s22 = sshll.u32 %s871_s0, 4  ;;  %s60_s20 = int_to_ptr.vmem [resolvable:$true] %s59_s20  ;;  %s24_s22 = int_to_ptr.hbm [resolvable:$true] %s23_s22 }
   0x8   :  { %65 = dma.hbm_to_vmem [thread:$0]  %s58_s16, 1024, %s60_s20, [#allocation8], %s772_s17, %s772_s17, %s773_s18  }
   0x9   :  { %s47_s24 = sshll.u32 %s873_s2, 4  ;;  %s775_s25 = smov [#allocation2]   ;;  %s48_s24 = int_to_ptr.hbm [resolvable:$true] %s47_s24 }
   0xa   :  { %s25_s26 = sshll.u32 %s775_s25, 4  ;;  %s776_s27 = smov [#allocation6]   ;;  %s26_s26 = int_to_ptr.vmem [resolvable:$true] %s25_s26 }
   0xb   :  { %28 = dma.hbm_to_vmem [thread:$0]  %s24_s22, 128, %s26_s26, [#allocation3]  }
   0xc   :  { %s49_s28 = sshll.u32 %s776_s27, 4  ;;  %s72_s0 = sshll.u32 %s876_s5, 4  ;;  %s50_s28 = int_to_ptr.vmem [resolvable:$true] %s49_s28  ;;  %s73_s0 = int_to_ptr.hbm [resolvable:$true] %s72_s0 }
   0xd   :  { %52 = dma.hbm_to_vmem [thread:$0]  %s48_s24, 16, %s50_s28, [#allocation5]  }
   0xe   :  { %s87_s12 = sshll.u32 %s878_s7, 4  ;;  %s777_s13 = smov [#allocation9]   ;;  %s88_s12 = int_to_ptr.hbm [resolvable:$true] %s87_s12 }
   0xf   :  { %s74_s2 = sshll.u32 %s777_s13, 4  ;;  %s778_s14 = smov [#allocation10]   ;;  %s75_s2 = int_to_ptr.vmem [resolvable:$true] %s74_s2 }
  0x10   :  { %80 = dma.hbm_to_vmem [thread:$0]  %s73_s0, 1024, %s75_s2, [#allocation8], %s772_s17, %s772_s17, %s773_s18  }
  0x11   :  { %s89_s15 = sshll.u32 %s778_s14, 4  ;;  %s90_s15 = int_to_ptr.vmem [resolvable:$true] %s89_s15 }
  0x12   :  { %95 = dma.hbm_to_vmem [thread:$0]  %s88_s12, 1024, %s90_s15, [#allocation11], %s772_s17, %s772_s17, %s773_s18  }
  0x13   :  { %763 = dma.done.wait [#allocation3], 128  }
  0x14   :  { %764 = vsyncadd [#allocation3], 4294967168 }
  0x15   :  { %765 = dma.done.wait [#allocation5], 272  }
  0x16   :  { %766 = vsyncadd [#allocation5], 4294967024 }
  0x17   :  { %767 = dma.done.wait [#allocation8], 2048  }
  0x18   :  { %768 = vsyncadd [#allocation8], 4294965248 }
  0x19   :  { %769 = dma.done.wait [#allocation11], 1024  }
  0x1a   :  { %770 = vsyncadd [#allocation11], 4294966272  ;;  %v580_v0 = vld [vmem:[#allocation4 + $0x8] sm:$0xff]  ;;  %v579_v1 = vld [vmem:[#allocation4] sm:$0xff]  ;;  %vm141_vm0 = vcmask 261120  }
  0x1b   :  { %151 = vmatpush.bf16.msra.mxu0 %v580_v0  ;;  %v123_v2 = vld [vmem:[#allocation2] sm:$0xff]  ;;  %v588_v4 = vld [vmem:[#allocation7 + $0x38] sm:$0xff]  ;;  %v587_v5 = vld [vmem:[#allocation7 + $0x30] sm:$0xff] }
  0x1c   :  { %v124_v3 = vpack.c.bf16 %v123_v2, %v123_v2  ;;  %244 = vmatpush.bf16.msra.mxu1 %v588_v4  ;;  %v586_v6 = vld [vmem:[#allocation7 + $0x28] sm:$0xff]  ;;  %v585_v7 = vld [vmem:[#allocation7 + $0x20] sm:$0xff]  ;;  %v584_v8 = vld [vmem:[#allocation7 + $0x18] sm:$0xff] }
  0x1d   :  { %v159_v9 = vld [vmem:[#allocation6] sm:$0x1]  ;;  %v583_v10 = vld [vmem:[#allocation7 + $0x10] sm:$0xff]  ;;  %v582_v12 = vld [vmem:[#allocation7 + $0x8] sm:$0xff] }
  0x1e   :  { %v161_v11 = vpack.i.b16 %v159_v9, %v159_v9  ;;  %v581_v14 = vld [vmem:[#allocation7] sm:$0xff]  ;;  %v596_v34 = vld [vmem:[#allocation9 + $0x38] sm:$0xff]  ;;  %v595_v35 = vld [vmem:[#allocation9 + $0x30] sm:$0xff] }
  0x1f   :  { %152 = vmatpush.bf16.msra.mxu0 %v579_v1  ;;  %343 = vmatpush.bf16.msra.mxu2 %v596_v34  ;;  %v594_v36 = vld [vmem:[#allocation9 + $0x28] sm:$0xff]  ;;  %v593_v37 = vld [vmem:[#allocation9 + $0x20] sm:$0xff]  ;;  %v592_v38 = vld [vmem:[#allocation9 + $0x18] sm:$0xff] }
  0x20   :  { %245 = vmatpush.bf16.msra.mxu1 %v587_v5  ;;  %v163_v13 = vperm.slane %v161_v11, 0  ;;  %v258_v39 = vld [vmem:[%s875_s4] sm:$0x1]  ;;  %v591_v40 = vld [vmem:[#allocation9 + $0x10] sm:$0xff]  ;;  %v590_v42 = vld [vmem:[#allocation9 + $0x8] sm:$0xff] }
  0x21   :  { %v260_v41 = vpack.i.b16 %v258_v39, %v258_v39  ;;  %v589_v44 = vld [vmem:[#allocation9] sm:$0xff]  ;;  %v604_v0 = vld [vmem:[#allocation10 + $0x38] sm:$0xff]  ;;  %v603_v1 = vld [vmem:[#allocation10 + $0x30] sm:$0xff] }
  0x22   :  { %482 = vmatmul.msk.bf16.vlgmr.msra.gmra.mxu0 %vm141_vm0, %v124_v3  ;;  %v165_v17 = vunpack.c.l.bf16 %v163_v13  ;;  %442 = vmatpush.bf16.msra.mxu3 %v604_v0  ;;  %v602_v2 = vld [vmem:[#allocation10 + $0x28] sm:$0xff]  ;;  %v601_v3 = vld [vmem:[#allocation10 + $0x20] sm:$0xff]  ;;  %v600_v4 = vld [vmem:[#allocation10 + $0x18] sm:$0xff] }
  0x23   :  { %344 = vmatpush.bf16.msra.mxu2 %v595_v35  ;;  %v262_v43 = vperm.slane %v260_v41, 0  ;;  %v357_v5 = vld [vmem:[%s877_s6] sm:$0x1] }
  0x24   :  { %246 = vmatpush.bf16.msra.mxu1 %v586_v6  ;;  %v599_v6 = vld [vmem:[#allocation10 + $0x10] sm:$0xff] }
  0x25   :  { %v264_v47 = vunpack.c.l.bf16 %v262_v43 }
  0x26   :  { %443 = vmatpush.bf16.msra.mxu3 %v603_v1 }
  0x27   :  { %345 = vmatpush.bf16.msra.mxu2 %v594_v36 }
  0x28   :  { %247 = vmatpush.bf16.msra.mxu1 %v585_v7  ;;  %v359_v7 = vpack.i.b16 %v357_v5, %v357_v5 }
  0x2a   :  { %444 = vmatpush.bf16.msra.mxu3 %v602_v2  ;;  %v361_v9 = vperm.slane %v359_v7, 0 }
  0x2b   :  { %346 = vmatpush.bf16.msra.mxu2 %v593_v37 }
  0x2c   :  { %248 = vmatpush.bf16.msra.mxu1 %v584_v8  ;;  %v598_v8 = vld [vmem:[#allocation10 + $0x8] sm:$0xff]  ;;  %v363_v13 = vunpack.c.l.bf16 %v361_v9 }
  0x2e   :  { %445 = vmatpush.bf16.msra.mxu3 %v601_v3 }
  0x2f   :  { %347 = vmatpush.bf16.msra.mxu2 %v592_v38 }
  0x30   :  { %249 = vmatpush.bf16.msra.mxu1 %v583_v10  ;;  %v597_v10 = vld [vmem:[#allocation10] sm:$0xff] }
  0x32   :  { %446 = vmatpush.bf16.msra.mxu3 %v600_v4 }
  0x33   :  { %348 = vmatpush.bf16.msra.mxu2 %v591_v40 }
  0x34   :  { %250 = vmatpush.bf16.msra.mxu1 %v582_v12 }
  0x36   :  { %447 = vmatpush.bf16.msra.mxu3 %v599_v6 }
  0x37   :  { %349 = vmatpush.bf16.msra.mxu2 %v590_v42 }
  0x38   :  { %251 = vmatpush.bf16.msra.mxu1 %v581_v14 }
  0x3a   :  { %448 = vmatpush.bf16.msra.mxu3 %v598_v8 }
  0x3b   :  { %350 = vmatpush.bf16.msra.mxu2 %v589_v44 }
  0x3e   :  { %449 = vmatpush.bf16.msra.mxu3 %v597_v10 }
  0x9f   :  { %v154_v15 = vpop.f32.mrf.mxu0 }
  0xa0   :  { %v158_v16 = vpack.c.bf16 %v154_v15, %v154_v15 }
  0xa2   :  { %v164_v18 = vunpack.c.l.bf16 %v158_v16 }
  0xa4   :  { %v166_v19 = vadd.f32 %v165_v17, %v164_v18 }
  0xa6   :  { %v167_v20 = vpack.c.bf16 %v166_v19, %v166_v19 }
  0xa7   :  { %v156_v21 = vpop.f32.mrf.mxu0 }
  0xa8   :  { %v168_v22 = vunpack.c.l.bf16 %v167_v20 }
  0xaa   :  { %v169_v23 = vmul.f32 0.5, %v168_v22 }
  0xac   :  { %v170_v24 = vpack.c.bf16 %v169_v23, %v169_v23 }
  0xae   :  { %v171_v25 = vunpack.c.l.bf16 %v170_v24 }
  0xb0   :  { %613 = vtanh.f32 %v171_v25 }
  0xb6   :  { %v614_v26 = vpop.eup %613 }
  0xb7   :  { %v173_v27 = vpack.c.bf16 %v614_v26, %v614_v26 }
  0xb9   :  { %v174_v28 = vunpack.c.l.bf16 %v173_v27 }
  0xbb   :  { %v175_v29 = vadd.f32 1.0, %v174_v28 }
  0xbd   :  { %v176_v30 = vpack.c.bf16 %v175_v29, %v175_v29 }
  0xbf   :  { %v177_v31 = vunpack.c.l.bf16 %v176_v30  ;;  %v456_v30 = vld [vmem:[%s879_s8] sm:$0x1] }
  0xc1   :  { %v178_v32 = vmul.f32 0.5, %v177_v31  ;;  %v458_v31 = vpack.i.b16 %v456_v30, %v456_v30 }
  0xc3   :  { %v179_v33 = vpack.c.bf16 %v178_v32, %v178_v32  ;;  %v460_v32 = vperm.slane %v458_v31, 0 }
  0xc5   :  { %252 = vmatmul.bf16.vlgmr.msra.gmra.mxu1 %v179_v33  ;;  %v462_v35 = vunpack.c.l.bf16 %v460_v32 }
 0x142   :  { %v253_v45 = vpop.f32.mrf.mxu1 }
 0x143   :  { %v257_v46 = vpack.c.bf16 %v253_v45, %v253_v45 }
 0x145   :  { %v263_v48 = vunpack.c.l.bf16 %v257_v46 }
 0x147   :  { %v265_v49 = vadd.f32 %v264_v47, %v263_v48 }
 0x149   :  { %v266_v50 = vpack.c.bf16 %v265_v49, %v265_v49 }
 0x14a   :  { %v255_v51 = vpop.f32.mrf.mxu1 }
 0x14b   :  { %v267_v52 = vunpack.c.l.bf16 %v266_v50 }
 0x14d   :  { %v268_v53 = vmul.f32 0.5, %v267_v52 }
 0x14f   :  { %v269_v54 = vpack.c.bf16 %v268_v53, %v268_v53 }
 0x151   :  { %v270_v55 = vunpack.c.l.bf16 %v269_v54 }
 0x153   :  { %615 = vtanh.f32 %v270_v55 }
 0x159   :  { %v616_v56 = vpop.eup %615 }
 0x15a   :  { %v272_v57 = vpack.c.bf16 %v616_v56, %v616_v56 }
 0x15c   :  { %v273_v58 = vunpack.c.l.bf16 %v272_v57 }
 0x15e   :  { %v274_v59 = vadd.f32 1.0, %v273_v58 }
 0x160   :  { %v275_v60 = vpack.c.bf16 %v274_v59, %v274_v59 }
 0x162   :  { %v276_v61 = vunpack.c.l.bf16 %v275_v60 }
 0x164   :  { %v277_v62 = vmul.f32 0.5, %v276_v61 }
 0x166   :  { %v278_v63 = vpack.c.bf16 %v277_v62, %v277_v62 }
 0x168   :  { %351 = vmatmul.bf16.vlgmr.msra.gmra.mxu2 %v278_v63 }
 0x1eb   :  { %v352_v11 = vpop.f32.mrf.mxu2 }
 0x1ec   :  { %v356_v12 = vpack.c.bf16 %v352_v11, %v352_v11 }
 0x1ee   :  { %v362_v14 = vunpack.c.l.bf16 %v356_v12 }
 0x1f0   :  { %v364_v15 = vadd.f32 %v363_v13, %v362_v14 }
 0x1f2   :  { %v365_v16 = vpack.c.bf16 %v364_v15, %v364_v15 }
 0x1f3   :  { %v354_v17 = vpop.f32.mrf.mxu2 }
 0x1f4   :  { %v366_v18 = vunpack.c.l.bf16 %v365_v16 }
 0x1f6   :  { %v367_v19 = vmul.f32 0.5, %v366_v18 }
 0x1f8   :  { %v368_v20 = vpack.c.bf16 %v367_v19, %v367_v19 }
 0x1fa   :  { %v369_v21 = vunpack.c.l.bf16 %v368_v20 }
 0x1fc   :  { %617 = vtanh.f32 %v369_v21 }
 0x202   :  { %v618_v22 = vpop.eup %617 }
 0x203   :  { %v371_v23 = vpack.c.bf16 %v618_v22, %v618_v22 }
 0x205   :  { %v372_v24 = vunpack.c.l.bf16 %v371_v23 }
 0x207   :  { %v373_v25 = vadd.f32 1.0, %v372_v24 }
 0x209   :  { %v374_v26 = vpack.c.bf16 %v373_v25, %v373_v25 }
 0x20b   :  { %v375_v27 = vunpack.c.l.bf16 %v374_v26 }
 0x20d   :  { %v376_v28 = vmul.f32 0.5, %v375_v27 }
 0x20f   :  { %v377_v29 = vpack.c.bf16 %v376_v28, %v376_v28 }
 0x211   :  { %450 = vmatmul.bf16.vlgmr.msra.gmra.mxu3 %v377_v29 }
 0x294   :  { %v451_v33 = vpop.f32.mrf.mxu3 }
 0x295   :  { %v455_v34 = vpack.c.bf16 %v451_v33, %v451_v33 }
 0x297   :  { %v461_v36 = vunpack.c.l.bf16 %v455_v34 }
 0x299   :  { %v463_v37 = vadd.f32 %v462_v35, %v461_v36 }
 0x29b   :  { %v464_v38 = vpack.c.bf16 %v463_v37, %v463_v37 }
 0x29c   :  { %v453_v39 = vpop.f32.mrf.mxu3 }
 0x29d   :  { %465 = vst [vmem:[%s880_s9] sm:$0xf] %v464_v38 }
 0x29e   :  { %470 = vsyncpa [#allocation3], 1 }
 0x29f   :  { %471 = vsyncpa [#allocation5], 1 }
 0x2a0   :  { %472 = vsyncpa [#allocation8], 1 }
 0x2a1   :  { %473 = vsyncpa [#allocation11], 1 }

</bundles_post_ra>
